<compile_context>
chip_gen: v6e
topology: v6e:2x2x1
jax: 0.10.0
libtpu: 0.0.40
codegen_flags: <defaults>
</compile_context>

<pallas_src>
import functools

import jax
import jax.numpy as jnp
from jax.experimental import pallas as pl
from jax.experimental.pallas import tpu as pltpu


# --------------------------------------------------------------------------
# Kernel
# --------------------------------------------------------------------------
def _attention_kernel(x_ref, w_qkv_ref, b_qkv_ref, w_out_ref, b_out_ref, o_ref,
                      *, seq_len, heads, dim_head, ln_eps, compute_dtype):
    rows, D = x_ref.shape
    N = seq_len
    bb = rows // N                      # batches in this grid block (static)
    inner = heads * dim_head
    f32 = jnp.float32

    x = x_ref[...].astype(f32)                                    # (rows, D)

    # --- LayerNorm statistics in f32 (the LN affine + SSF0/SSF1/SSF2 and the
    #     1/sqrt(dh) attention scale are folded into the weights/biases). ---
    mean = jnp.mean(x, axis=-1, keepdims=True)
    var = jnp.mean(jnp.square(x - mean), axis=-1, keepdims=True)
    xhat = (x - mean) * jax.lax.rsqrt(var + ln_eps)

    # --- ONE lane-dense QKV projection: (rows, D) @ (D, 3*inner) ----------
    qkv = jnp.dot(xhat.astype(compute_dtype), w_qkv_ref[...],
                  preferred_element_type=f32) + b_qkv_ref[...]    # (rows, 3*inner)

    # --- regroup into per-(batch, head) blocks for the attention matmuls.
    #     Pure relayout (static slices + stack); no matmuls, no broadcasts.
    def heads_of(col0):
        blocks = []
        for b in range(bb):
            r0 = b * N
            for h in range(heads):
                c0 = col0 + h * dim_head
                blocks.append(qkv[r0:r0 + N, c0:c0 + dim_head])
        return jnp.stack(blocks, axis=0).astype(compute_dtype)    # (bb*H, N, dh)

    q = heads_of(0)
    k = heads_of(inner)
    v = heads_of(2 * inner)

    # --- scaled dot-product attention (scale folded into the Q columns). ---
    # TODO(synk): before scaling N, add a KV grid axis ("arbitrary") with
    # online-softmax accumulators (flash tiling) instead of the full (Z,N,N)
    # score block, and pad rows to a multiple of 16 for bf16 sublane packing.
    dots = jnp.einsum("znd,zmd->znm", q, k, preferred_element_type=f32)
    dots = dots - jnp.max(dots, axis=-1, keepdims=True)
    e = jnp.exp(dots)
    attn = e * pl.reciprocal(jnp.sum(e, axis=-1, keepdims=True), approx=True)

    out_h = jnp.einsum("znm,zmd->znd", attn.astype(compute_dtype), v,
                       preferred_element_type=f32)                # (bb*H, N, dh)

    # --- back to (rows, inner): the cross-head sum is fused into the single
    #     output-projection contraction (no (H,N,D) temporary, no axis-0 sum).
    per_batch = [
        jnp.concatenate([out_h[b * heads + h] for h in range(heads)], axis=-1)
        for b in range(bb)
    ]
    out2d = per_batch[0] if bb == 1 else jnp.concatenate(per_batch, axis=0)

    o = jnp.dot(out2d.astype(compute_dtype), w_out_ref[...],
                preferred_element_type=f32) + b_out_ref[...]      # (rows, D)
    o_ref[...] = o.astype(o_ref.dtype)


# --------------------------------------------------------------------------
# Wrapper
# --------------------------------------------------------------------------
def _const_spec(shape):
    nd = len(shape)
    return pl.BlockSpec(shape, lambda i, _nd=nd: (0,) * _nd)


def _default_batch_blocks(batch):
    """v7x has 2 TensorCores -> keep a 2-wide parallel grid axis; single-TC
    v5e/v6e collapse the batch into one grid step (less fixed per-step
    overhead, denser DMAs and stores)."""
    try:
        kind = jax.devices()[0].device_kind.lower()
    except Exception:
        kind = ""
    n_tc = 2 if ("v7" in kind or "7x" in kind) else 1
    return max(1, min(batch, n_tc))


def attention_forward(x, params, *, heads, dim_head, ln_eps=1e-5,
                      compute_dtype=jnp.bfloat16, num_batch_blocks=None):
    """x: (B, N, D) float32. params: dict of module weights (see init_params)."""
    B, N, D = x.shape
    inner = heads * dim_head
    scale = dim_head ** (-0.5)
    f32 = jnp.float32

    # ---------- fold LayerNorm affine + SSF0 / SSF1 / SSF2 into weights ----
    g = params["ln_w"] * params["ssf_scale_0"]                               # (D,)
    beta = params["ln_b"] * params["ssf_scale_0"] + params["ssf_shift_0"]    # (D,)

    w_qkv = params["w_qkv"] * params["ssf_scale_1"][None, :]                 # (D, 3*inner)
    b_qkv = beta @ w_qkv + params["ssf_shift_1"]                             # (3*inner,)
    w_qkv = g[:, None] * w_qkv

    # fold the 1/sqrt(dh) attention scale into the Q columns (weight + bias)
    col_scale = jnp.concatenate(
        [jnp.full((inner,), scale, f32), jnp.ones((2 * inner,), f32)])
    w_qkv = w_qkv * col_scale[None, :]
    b_qkv = b_qkv * col_scale

    w_out = params["w_out"] * params["ssf_scale_2"][None, :]                 # (inner, D)
    b_out = params["b_out"] * params["ssf_scale_2"] + params["ssf_shift_2"]  # (D,)

    w_qkv_c = w_qkv.astype(compute_dtype)                  # (D, 3*inner), lane-dense
    b_qkv_c = b_qkv.reshape(1, 3 * inner).astype(f32)
    w_out_c = w_out.astype(compute_dtype)                  # (inner, D)
    b_out_c = b_out.reshape(1, D).astype(f32)

    # ---------- grid: tile rows of the flattened (B*N, D) input ------------
    if num_batch_blocks is None:
        num_batch_blocks = _default_batch_blocks(B)
    num_batch_blocks = max(1, min(int(num_batch_blocks), B))
    while B % num_batch_blocks:
        num_batch_blocks -= 1
    bb = B // num_batch_blocks
    rows = bb * N

    x2d = x.reshape(B * N, D)

    kernel = functools.partial(
        _attention_kernel, seq_len=N, heads=heads, dim_head=dim_head,
        ln_eps=ln_eps, compute_dtype=compute_dtype)

    # ---------- cost / VMEM sizing derived from the actual footprint -------
    cw = jnp.dtype(compute_dtype).itemsize
    xw = x.dtype.itemsize
    io_bytes = 2 * 2 * rows * D * xw                          # x + out, double-buffered
    w_bytes = 2 * (w_qkv_c.size * cw + w_out_c.size * cw
                   + b_qkv_c.size * 4 + b_out_c.size * 4)
    live_bytes = 4 * (rows * 3 * inner                        # qkv (f32)
                      + 4 * bb * heads * N * dim_head         # q, k, v, out_h
                      + 2 * bb * heads * N * N                # scores, exp
                      + rows * inner + rows * D)              # out2d, o
    # generous headroom for (8,128) tile padding + internal scratch
    vmem_limit = int(min(100 * 2**20,
                         max(8 * 2**20, 8 * (io_bytes + w_bytes + live_bytes))))

    flops = int(B * (2 * N * D * 3 * inner            # QKV projection
                     + 4 * heads * N * N * dim_head   # scores + attn @ V
                     + 2 * N * inner * D))            # output projection
    transcendentals = int(B * (heads * N * N + heads * N + N))   # exp + rcp + rsqrt
    bytes_accessed = int(2 * B * N * D * xw
                         + (w_qkv_c.size + w_out_c.size) * cw
                         + (b_qkv_c.size + b_out_c.size) * 4)

    out2d = pl.pallas_call(
        kernel,
        out_shape=jax.ShapeDtypeStruct((B * N, D), x.dtype),
        grid=(num_batch_blocks,),
        in_specs=[
            pl.BlockSpec((rows, D), lambda i: (i, 0)),     # x rows
            _const_spec(w_qkv_c.shape),                    # W_qkv  (folded)
            _const_spec(b_qkv_c.shape),                    # b_qkv  (folded)
            _const_spec(w_out_c.shape),                    # W_out  (folded)
            _const_spec(b_out_c.shape),                    # b_out  (folded)
        ],
        out_specs=pl.BlockSpec((rows, D), lambda i: (i, 0)),
        compiler_params=pltpu.CompilerParams(
            dimension_semantics=("parallel",),
            vmem_limit_bytes=vmem_limit),
        cost_estimate=pl.CostEstimate(
            flops=flops, transcendentals=transcendentals,
            bytes_accessed=bytes_accessed),
    )(x2d, w_qkv_c, b_qkv_c, w_out_c, b_out_c)

    return out2d.reshape(B, N, D)


# --------------------------------------------------------------------------
# Parameters + pure-JAX reference
# --------------------------------------------------------------------------
def init_params(key, dim, heads, dim_head):
    """Deterministic synthetic parameters matching the module's shapes."""
    inner = heads * dim_head
    keys = jax.random.split(key, 8)
    return {
        # LayerNorm
        "ln_w": jnp.ones((dim,), jnp.float32),
        "ln_b": jnp.zeros((dim,), jnp.float32),
        # SSF 0 (dim)
        "ssf_scale_0": 1.0 + 0.02 * jax.random.normal(keys[0], (dim,), jnp.float32),
        "ssf_shift_0": 0.02 * jax.random.normal(keys[1], (dim,), jnp.float32),
        # to_qkv: Linear(dim, 3*inner, bias=False); stored pre-transposed (dim, 3*inner)
        "w_qkv": 0.05 * jax.random.normal(keys[2], (dim, 3 * inner), jnp.float32),
        # SSF 1 (3*inner)
        "ssf_scale_1": 1.0 + 0.02 * jax.random.normal(keys[3], (3 * inner,), jnp.float32),
        "ssf_shift_1": 0.02 * jax.random.normal(keys[4], (3 * inner,), jnp.float32),
        # to_out[0]: Linear(inner, dim); stored pre-transposed (inner, dim)
        "w_out": 0.05 * jax.random.normal(keys[5], (inner, dim), jnp.float32),
        "b_out": 0.02 * jax.random.normal(keys[6], (dim,), jnp.float32),
        # SSF 2 (dim)
        "ssf_scale_2": 1.0 + 0.02 * jax.random.normal(keys[7], (dim,), jnp.float32),
        "ssf_shift_2": jnp.zeros((dim,), jnp.float32),
    }


def attention_reference(x, params, *, heads, dim_head, ln_eps=1e-5):
    """Pure-JAX reference mirroring the PyTorch forward (unfolded params)."""
    B, N, D = x.shape
    inner = heads * dim_head
    mean = jnp.mean(x, axis=-1, keepdims=True)
    var = jnp.mean((x - mean) ** 2, axis=-1, keepdims=True)
    h = (x - mean) * jax.lax.rsqrt(var + ln_eps) * params["ln_w"] + params["ln_b"]
    h = h * params["ssf_scale_0"] + params["ssf_shift_0"]
    qkv = h @ params["w_qkv"]
    qkv = qkv * params["ssf_scale_1"] + params["ssf_shift_1"]
    q, k, v = jnp.split(qkv, 3, axis=-1)
    reshape_heads = lambda t: t.reshape(B, N, heads, dim_head).transpose(0, 2, 1, 3)
    q, k, v = map(reshape_heads, (q, k, v))
    dots = jnp.einsum("bhnd,bhmd->bhnm", q, k) * (dim_head ** -0.5)
    attn = jax.nn.softmax(dots, axis=-1)
    out = jnp.einsum("bhnm,bhmd->bhnd", attn, v)
    out = out.transpose(0, 2, 1, 3).reshape(B, N, inner)
    out = out @ params["w_out"] + params["b_out"]
    return out * params["ssf_scale_2"] + params["ssf_shift_2"]


# --------------------------------------------------------------------------
# Main
# --------------------------------------------------------------------------
if __name__ == "__main__":
    # Small shapes consistent with the module: dim=32, heads=4, dim_head=16.
    B, N, D = 2, 8, 32
    HEADS, DIM_HEAD = 4, 16

    key = jax.random.PRNGKey(0)
    kx, kp = jax.random.split(key)
    x = jax.random.normal(kx, (B, N, D), jnp.float32)
    params = init_params(kp, D, HEADS, DIM_HEAD)

    ref = attention_reference(x, params, heads=HEADS, dim_head=DIM_HEAD)

    # Default path: bf16 MXU operands, f32 stats/accumulation, auto grid.
    out_bf16 = jax.block_until_ready(
        attention_forward(x, params, heads=HEADS, dim_head=DIM_HEAD))
    assert out_bf16.shape == (B, N, D)
    assert jnp.allclose(out_bf16, ref, atol=2.5e-2, rtol=2.5e-2), \
        "bf16-compute kernel mismatch vs reference"

    # f32 compute, collapsed batch grid (single step; v5e/v6e-style).
    out_f32_one = jax.block_until_ready(
        attention_forward(x, params, heads=HEADS, dim_head=DIM_HEAD,
                          compute_dtype=jnp.float32, num_batch_blocks=1))
    assert jnp.allclose(out_f32_one, ref, atol=2e-3, rtol=2e-3), \
        "f32 (collapsed grid) kernel mismatch vs reference"

    # f32 compute, 2-wide parallel grid (v7x-style megacore split).
    out_f32_two = jax.block_until_ready(
        attention_forward(x, params, heads=HEADS, dim_head=DIM_HEAD,
                          compute_dtype=jnp.float32, num_batch_blocks=2))
    assert jnp.allclose(out_f32_two, ref, atol=2e-3, rtol=2e-3), \
        "f32 (split grid) kernel mismatch vs reference"

    print("KERNEL_OK")
</pallas_src>

<mosaic_0001>
module attributes {stable_mosaic.version = 11 : i64} {
  func.func @_attention_kernel(%arg0: i32, %arg1: memref<16x32xf32, #tpu.memory_space<vmem>>, %arg2: memref<32x192xbf16, #tpu.memory_space<vmem>>, %arg3: memref<1x192xf32, #tpu.memory_space<vmem>>, %arg4: memref<64x32xbf16, #tpu.memory_space<vmem>>, %arg5: memref<1x32xf32, #tpu.memory_space<vmem>>, %arg6: memref<16x32xf32, #tpu.memory_space<vmem>>) attributes {dimension_semantics = [#tpu.dimension_semantics<parallel>], iteration_bounds = array<i64: 1>, scalar_prefetch = 0 : i64, scratch_operands = 0 : i64, tpu.core_type = #tpu.core_type<tc>, window_params = [{transform_indices = @transform_0, window_bounds = array<i64: 16, 32>}, {pipeline_mode = #tpu.pipeline_mode<synchronous>, transform_indices = @transform_1, window_bounds = array<i64: 32, 192>}, {pipeline_mode = #tpu.pipeline_mode<synchronous>, transform_indices = @transform_2, window_bounds = array<i64: 1, 192>}, {pipeline_mode = #tpu.pipeline_mode<synchronous>, transform_indices = @transform_3, window_bounds = array<i64: 64, 32>}, {pipeline_mode = #tpu.pipeline_mode<synchronous>, transform_indices = @transform_4, window_bounds = array<i64: 1, 32>}, {transform_indices = @transform_5, window_bounds = array<i64: 16, 32>}]} {
    %c0 = arith.constant 0 : index
    %c0_0 = arith.constant 0 : index
    %0 = vector.load %arg1[%c0, %c0_0] : memref<16x32xf32, #tpu.memory_space<vmem>>, vector<16x32xf32>
    %cst = arith.constant dense<0.000000e+00> : vector<16xf32>
    %1 = vector.multi_reduction <add>, %0, %cst [1] : vector<16x32xf32> to vector<16xf32>
    %2 = vector.shape_cast %1 : vector<16xf32> to vector<16x1xf32>
    %cst_1 = arith.constant 3.200000e+01 : f32
    %3 = vector.broadcast %cst_1 : f32 to vector<16x1xf32>
    %4 = arith.divf %2, %3 : vector<16x1xf32>
    %5 = vector.broadcast %4 : vector<16x1xf32> to vector<16x32xf32>
    %6 = arith.subf %0, %5 : vector<16x32xf32>
    %7 = arith.mulf %6, %6 : vector<16x32xf32>
    %cst_2 = arith.constant dense<0.000000e+00> : vector<16xf32>
    %8 = vector.multi_reduction <add>, %7, %cst_2 [1] : vector<16x32xf32> to vector<16xf32>
    %9 = vector.shape_cast %8 : vector<16xf32> to vector<16x1xf32>
    %cst_3 = arith.constant 3.200000e+01 : f32
    %10 = vector.broadcast %cst_3 : f32 to vector<16x1xf32>
    %11 = arith.divf %9, %10 : vector<16x1xf32>
    %12 = vector.broadcast %4 : vector<16x1xf32> to vector<16x32xf32>
    %13 = arith.subf %0, %12 : vector<16x32xf32>
    %cst_4 = arith.constant 9.99999974E-6 : f32
    %14 = vector.broadcast %cst_4 : f32 to vector<16x1xf32>
    %15 = arith.addf %11, %14 : vector<16x1xf32>
    %16 = math.rsqrt %15 : vector<16x1xf32>
    %17 = vector.broadcast %16 : vector<16x1xf32> to vector<16x32xf32>
    %18 = arith.mulf %13, %17 : vector<16x32xf32>
    %19 = arith.truncf %18 : vector<16x32xf32> to vector<16x32xbf16>
    %c0_5 = arith.constant 0 : index
    %c0_6 = arith.constant 0 : index
    %20 = vector.load %arg2[%c0_5, %c0_6] : memref<32x192xbf16, #tpu.memory_space<vmem>>, vector<32x192xbf16>
    %cst_7 = arith.constant dense<0.000000e+00> : vector<16x192xf32>
    %21 = tpu.matmul %19, %20, %cst_7 {dimension_numbers = #tpu.dot_dimension_numbers<[1], [0], [0], [1], [0, 0, 1, 1], [], []>} : vector<16x32xbf16>, vector<32x192xbf16>, vector<16x192xf32> -> vector<16x192xf32>
    %c0_8 = arith.constant 0 : index
    %c0_9 = arith.constant 0 : index
    %22 = vector.load %arg3[%c0_8, %c0_9] : memref<1x192xf32, #tpu.memory_space<vmem>>, vector<1x192xf32>
    %23 = vector.broadcast %22 : vector<1x192xf32> to vector<16x192xf32>
    %24 = arith.addf %21, %23 : vector<16x192xf32>
    %25 = vector.extract_strided_slice %24 {offsets = [0, 0], sizes = [8, 16], strides = [1, 1]} : vector<16x192xf32> to vector<8x16xf32>
    %26 = vector.extract_strided_slice %24 {offsets = [0, 16], sizes = [8, 16], strides = [1, 1]} : vector<16x192xf32> to vector<8x16xf32>
    %27 = vector.extract_strided_slice %24 {offsets = [0, 32], sizes = [8, 16], strides = [1, 1]} : vector<16x192xf32> to vector<8x16xf32>
    %28 = vector.extract_strided_slice %24 {offsets = [0, 48], sizes = [8, 16], strides = [1, 1]} : vector<16x192xf32> to vector<8x16xf32>
    %29 = vector.extract_strided_slice %24 {offsets = [8, 0], sizes = [8, 16], strides = [1, 1]} : vector<16x192xf32> to vector<8x16xf32>
    %30 = vector.extract_strided_slice %24 {offsets = [8, 16], sizes = [8, 16], strides = [1, 1]} : vector<16x192xf32> to vector<8x16xf32>
    %31 = vector.extract_strided_slice %24 {offsets = [8, 32], sizes = [8, 16], strides = [1, 1]} : vector<16x192xf32> to vector<8x16xf32>
    %32 = vector.extract_strided_slice %24 {offsets = [8, 48], sizes = [8, 16], strides = [1, 1]} : vector<16x192xf32> to vector<8x16xf32>
    %33 = vector.shape_cast %25 : vector<8x16xf32> to vector<1x8x16xf32>
    %34 = vector.shape_cast %26 : vector<8x16xf32> to vector<1x8x16xf32>
    %35 = vector.shape_cast %27 : vector<8x16xf32> to vector<1x8x16xf32>
    %36 = vector.shape_cast %28 : vector<8x16xf32> to vector<1x8x16xf32>
    %37 = vector.shape_cast %29 : vector<8x16xf32> to vector<1x8x16xf32>
    %38 = vector.shape_cast %30 : vector<8x16xf32> to vector<1x8x16xf32>
    %39 = vector.shape_cast %31 : vector<8x16xf32> to vector<1x8x16xf32>
    %40 = vector.shape_cast %32 : vector<8x16xf32> to vector<1x8x16xf32>
    %41 = tpu.concatenate %33, %34, %35, %36, %37, %38, %39, %40 in 0 : vector<1x8x16xf32>, vector<1x8x16xf32>, vector<1x8x16xf32>, vector<1x8x16xf32>, vector<1x8x16xf32>, vector<1x8x16xf32>, vector<1x8x16xf32>, vector<1x8x16xf32> -> vector<8x8x16xf32>
    %42 = arith.truncf %41 : vector<8x8x16xf32> to vector<8x8x16xbf16>
    %43 = vector.extract_strided_slice %24 {offsets = [0, 64], sizes = [8, 16], strides = [1, 1]} : vector<16x192xf32> to vector<8x16xf32>
    %44 = vector.extract_strided_slice %24 {offsets = [0, 80], sizes = [8, 16], strides = [1, 1]} : vector<16x192xf32> to vector<8x16xf32>
    %45 = vector.extract_strided_slice %24 {offsets = [0, 96], sizes = [8, 16], strides = [1, 1]} : vector<16x192xf32> to vector<8x16xf32>
    %46 = vector.extract_strided_slice %24 {offsets = [0, 112], sizes = [8, 16], strides = [1, 1]} : vector<16x192xf32> to vector<8x16xf32>
    %47 = vector.extract_strided_slice %24 {offsets = [8, 64], sizes = [8, 16], strides = [1, 1]} : vector<16x192xf32> to vector<8x16xf32>
    %48 = vector.extract_strided_slice %24 {offsets = [8, 80], sizes = [8, 16], strides = [1, 1]} : vector<16x192xf32> to vector<8x16xf32>
    %49 = vector.extract_strided_slice %24 {offsets = [8, 96], sizes = [8, 16], strides = [1, 1]} : vector<16x192xf32> to vector<8x16xf32>
    %50 = vector.extract_strided_slice %24 {offsets = [8, 112], sizes = [8, 16], strides = [1, 1]} : vector<16x192xf32> to vector<8x16xf32>
    %51 = vector.shape_cast %43 : vector<8x16xf32> to vector<1x8x16xf32>
    %52 = vector.shape_cast %44 : vector<8x16xf32> to vector<1x8x16xf32>
    %53 = vector.shape_cast %45 : vector<8x16xf32> to vector<1x8x16xf32>
    %54 = vector.shape_cast %46 : vector<8x16xf32> to vector<1x8x16xf32>
    %55 = vector.shape_cast %47 : vector<8x16xf32> to vector<1x8x16xf32>
    %56 = vector.shape_cast %48 : vector<8x16xf32> to vector<1x8x16xf32>
    %57 = vector.shape_cast %49 : vector<8x16xf32> to vector<1x8x16xf32>
    %58 = vector.shape_cast %50 : vector<8x16xf32> to vector<1x8x16xf32>
    %59 = tpu.concatenate %51, %52, %53, %54, %55, %56, %57, %58 in 0 : vector<1x8x16xf32>, vector<1x8x16xf32>, vector<1x8x16xf32>, vector<1x8x16xf32>, vector<1x8x16xf32>, vector<1x8x16xf32>, vector<1x8x16xf32>, vector<1x8x16xf32> -> vector<8x8x16xf32>
    %60 = arith.truncf %59 : vector<8x8x16xf32> to vector<8x8x16xbf16>
    %61 = vector.extract_strided_slice %24 {offsets = [0, 128], sizes = [8, 16], strides = [1, 1]} : vector<16x192xf32> to vector<8x16xf32>
    %62 = vector.extract_strided_slice %24 {offsets = [0, 144], sizes = [8, 16], strides = [1, 1]} : vector<16x192xf32> to vector<8x16xf32>
    %63 = vector.extract_strided_slice %24 {offsets = [0, 160], sizes = [8, 16], strides = [1, 1]} : vector<16x192xf32> to vector<8x16xf32>
    %64 = vector.extract_strided_slice %24 {offsets = [0, 176], sizes = [8, 16], strides = [1, 1]} : vector<16x192xf32> to vector<8x16xf32>
    %65 = vector.extract_strided_slice %24 {offsets = [8, 128], sizes = [8, 16], strides = [1, 1]} : vector<16x192xf32> to vector<8x16xf32>
    %66 = vector.extract_strided_slice %24 {offsets = [8, 144], sizes = [8, 16], strides = [1, 1]} : vector<16x192xf32> to vector<8x16xf32>
    %67 = vector.extract_strided_slice %24 {offsets = [8, 160], sizes = [8, 16], strides = [1, 1]} : vector<16x192xf32> to vector<8x16xf32>
    %68 = vector.extract_strided_slice %24 {offsets = [8, 176], sizes = [8, 16], strides = [1, 1]} : vector<16x192xf32> to vector<8x16xf32>
    %69 = vector.shape_cast %61 : vector<8x16xf32> to vector<1x8x16xf32>
    %70 = vector.shape_cast %62 : vector<8x16xf32> to vector<1x8x16xf32>
    %71 = vector.shape_cast %63 : vector<8x16xf32> to vector<1x8x16xf32>
    %72 = vector.shape_cast %64 : vector<8x16xf32> to vector<1x8x16xf32>
    %73 = vector.shape_cast %65 : vector<8x16xf32> to vector<1x8x16xf32>
    %74 = vector.shape_cast %66 : vector<8x16xf32> to vector<1x8x16xf32>
    %75 = vector.shape_cast %67 : vector<8x16xf32> to vector<1x8x16xf32>
    %76 = vector.shape_cast %68 : vector<8x16xf32> to vector<1x8x16xf32>
    %77 = tpu.concatenate %69, %70, %71, %72, %73, %74, %75, %76 in 0 : vector<1x8x16xf32>, vector<1x8x16xf32>, vector<1x8x16xf32>, vector<1x8x16xf32>, vector<1x8x16xf32>, vector<1x8x16xf32>, vector<1x8x16xf32>, vector<1x8x16xf32> -> vector<8x8x16xf32>
    %78 = arith.truncf %77 : vector<8x8x16xf32> to vector<8x8x16xbf16>
    "tpu.trace_start"() <{level = 10 : i32, message = "znd,zmd->znm"}> : () -> ()
    %cst_10 = arith.constant dense<0.000000e+00> : vector<8x8x8xf32>
    %79 = tpu.matmul %42, %60, %cst_10 {dimension_numbers = #tpu.dot_dimension_numbers<[2], [2], [1], [1], [0, 0, 0, 1, 1, 1], [0], [0]>} : vector<8x8x16xbf16>, vector<8x8x16xbf16>, vector<8x8x8xf32> -> vector<8x8x8xf32>
    "tpu.trace_stop"() : () -> ()
    %cst_11 = arith.constant dense<0xFF800000> : vector<8x8xf32>
    %80 = vector.multi_reduction <maximumf>, %79, %cst_11 [2] : vector<8x8x8xf32> to vector<8x8xf32>
    %81 = vector.shape_cast %80 : vector<8x8xf32> to vector<8x8x1xf32>
    %82 = vector.broadcast %81 : vector<8x8x1xf32> to vector<8x8x8xf32>
    %83 = arith.subf %79, %82 : vector<8x8x8xf32>
    %84 = math.exp %83 : vector<8x8x8xf32>
    %cst_12 = arith.constant dense<0.000000e+00> : vector<8x8xf32>
    %85 = vector.multi_reduction <add>, %84, %cst_12 [2] : vector<8x8x8xf32> to vector<8x8xf32>
    %86 = vector.shape_cast %85 : vector<8x8xf32> to vector<8x8x1xf32>
    %87 = tpu.reciprocal %86 {approx = true} : vector<8x8x1xf32> -> vector<8x8x1xf32>
    %88 = vector.broadcast %87 : vector<8x8x1xf32> to vector<8x8x8xf32>
    %89 = arith.mulf %84, %88 : vector<8x8x8xf32>
    %90 = arith.truncf %89 : vector<8x8x8xf32> to vector<8x8x8xbf16>
    "tpu.trace_start"() <{level = 10 : i32, message = "znm,zmd->znd"}> : () -> ()
    %cst_13 = arith.constant dense<0.000000e+00> : vector<8x8x16xf32>
    %91 = tpu.matmul %90, %78, %cst_13 {dimension_numbers = #tpu.dot_dimension_numbers<[2], [1], [1], [2], [0, 0, 0, 1, 1, 2], [0], [0]>} : vector<8x8x8xbf16>, vector<8x8x16xbf16>, vector<8x8x16xf32> -> vector<8x8x16xf32>
    "tpu.trace_stop"() : () -> ()
    %92 = vector.extract_strided_slice %91 {offsets = [0, 0, 0], sizes = [1, 8, 16], strides = [1, 1, 1]} : vector<8x8x16xf32> to vector<1x8x16xf32>
    %93 = vector.shape_cast %92 : vector<1x8x16xf32> to vector<8x16xf32>
    %94 = vector.extract_strided_slice %91 {offsets = [1, 0, 0], sizes = [1, 8, 16], strides = [1, 1, 1]} : vector<8x8x16xf32> to vector<1x8x16xf32>
    %95 = vector.shape_cast %94 : vector<1x8x16xf32> to vector<8x16xf32>
    %96 = vector.extract_strided_slice %91 {offsets = [2, 0, 0], sizes = [1, 8, 16], strides = [1, 1, 1]} : vector<8x8x16xf32> to vector<1x8x16xf32>
    %97 = vector.shape_cast %96 : vector<1x8x16xf32> to vector<8x16xf32>
    %98 = vector.extract_strided_slice %91 {offsets = [3, 0, 0], sizes = [1, 8, 16], strides = [1, 1, 1]} : vector<8x8x16xf32> to vector<1x8x16xf32>
    %99 = vector.shape_cast %98 : vector<1x8x16xf32> to vector<8x16xf32>
    %100 = tpu.concatenate %93, %95, %97, %99 in 1 : vector<8x16xf32>, vector<8x16xf32>, vector<8x16xf32>, vector<8x16xf32> -> vector<8x64xf32>
    %101 = vector.extract_strided_slice %91 {offsets = [4, 0, 0], sizes = [1, 8, 16], strides = [1, 1, 1]} : vector<8x8x16xf32> to vector<1x8x16xf32>
    %102 = vector.shape_cast %101 : vector<1x8x16xf32> to vector<8x16xf32>
    %103 = vector.extract_strided_slice %91 {offsets = [5, 0, 0], sizes = [1, 8, 16], strides = [1, 1, 1]} : vector<8x8x16xf32> to vector<1x8x16xf32>
    %104 = vector.shape_cast %103 : vector<1x8x16xf32> to vector<8x16xf32>
    %105 = vector.extract_strided_slice %91 {offsets = [6, 0, 0], sizes = [1, 8, 16], strides = [1, 1, 1]} : vector<8x8x16xf32> to vector<1x8x16xf32>
    %106 = vector.shape_cast %105 : vector<1x8x16xf32> to vector<8x16xf32>
    %107 = vector.extract_strided_slice %91 {offsets = [7, 0, 0], sizes = [1, 8, 16], strides = [1, 1, 1]} : vector<8x8x16xf32> to vector<1x8x16xf32>
    %108 = vector.shape_cast %107 : vector<1x8x16xf32> to vector<8x16xf32>
    %109 = tpu.concatenate %102, %104, %106, %108 in 1 : vector<8x16xf32>, vector<8x16xf32>, vector<8x16xf32>, vector<8x16xf32> -> vector<8x64xf32>
    %110 = tpu.concatenate %100, %109 in 0 : vector<8x64xf32>, vector<8x64xf32> -> vector<16x64xf32>
    %111 = arith.truncf %110 : vector<16x64xf32> to vector<16x64xbf16>
    %c0_14 = arith.constant 0 : index
    %c0_15 = arith.constant 0 : index
    %112 = vector.load %arg4[%c0_14, %c0_15] : memref<64x32xbf16, #tpu.memory_space<vmem>>, vector<64x32xbf16>
    %cst_16 = arith.constant dense<0.000000e+00> : vector<16x32xf32>
    %113 = tpu.matmul %111, %112, %cst_16 {dimension_numbers = #tpu.dot_dimension_numbers<[1], [0], [0], [1], [0, 0, 1, 1], [], []>} : vector<16x64xbf16>, vector<64x32xbf16>, vector<16x32xf32> -> vector<16x32xf32>
    %c0_17 = arith.constant 0 : index
    %c0_18 = arith.constant 0 : index
    %114 = vector.load %arg5[%c0_17, %c0_18] : memref<1x32xf32, #tpu.memory_space<vmem>>, vector<1x32xf32>
    %115 = vector.broadcast %114 : vector<1x32xf32> to vector<16x32xf32>
    %116 = arith.addf %113, %115 : vector<16x32xf32>
    %c0_19 = arith.constant 0 : index
    %c0_20 = arith.constant 0 : index
    %117 = vector.load %arg6[%c0_19, %c0_20] : memref<16x32xf32, #tpu.memory_space<vmem>>, vector<16x32xf32>
    tpu.vector_store %arg6[%c0_19, %c0_20], %116 {strides = array<i32>} : memref<16x32xf32, #tpu.memory_space<vmem>>, vector<16x32xf32>,
    return
  }
  func.func @transform_0(%arg0: i32) -> (i32, i32) {
    %c0_i32 = arith.constant 0 : i32
    %c0_i32_0 = arith.constant 0 : i32
    return %arg0, %c0_i32 : i32, i32
  }
  func.func @transform_1(%arg0: i32) -> (i32, i32) {
    %c0_i32 = arith.constant 0 : i32
    %c0_i32_0 = arith.constant 0 : i32
    %c0_i32_1 = arith.constant 0 : i32
    return %c0_i32, %c0_i32_0 : i32, i32
  }
  func.func @transform_2(%arg0: i32) -> (i32, i32) {
    %c0_i32 = arith.constant 0 : i32
    %c0_i32_0 = arith.constant 0 : i32
    %c0_i32_1 = arith.constant 0 : i32
    return %c0_i32, %c0_i32_0 : i32, i32
  }
  func.func @transform_3(%arg0: i32) -> (i32, i32) {
    %c0_i32 = arith.constant 0 : i32
    %c0_i32_0 = arith.constant 0 : i32
    %c0_i32_1 = arith.constant 0 : i32
    return %c0_i32, %c0_i32_0 : i32, i32
  }
  func.func @transform_4(%arg0: i32) -> (i32, i32) {
    %c0_i32 = arith.constant 0 : i32
    %c0_i32_0 = arith.constant 0 : i32
    %c0_i32_1 = arith.constant 0 : i32
    return %c0_i32, %c0_i32_0 : i32, i32
  }
  func.func @transform_5(%arg0: i32) -> (i32, i32) {
    %c0_i32 = arith.constant 0 : i32
    %c0_i32_0 = arith.constant 0 : i32
    return %arg0, %c0_i32 : i32, i32
  }
}

</mosaic_0001>

<bundles_post_ra>
// kernel: tpu_custom_call.1
= control target key start
LH: loop header
LB: loop body
LE: loop exit
PB: predicated region body
PF: predicated region fallthrough
CT: control target
= control target key end

     0   :  { %vm24_vm0 = vcmask 261120   ;;  %s1715_s0 = inlined_call_operand.vmem [shape: f32[16,32], index: 0, kind: input, shape index: {}]   ;;  %s1716_s1 = inlined_call_operand.vmem [shape: bf16[32,192], index: 1, kind: input, shape index: {}]   ;;  %s1717_s2 = inlined_call_operand.vmem [shape: f32[1,192], index: 2, kind: input, shape index: {}]   ;;  %s1718_s3 = inlined_call_operand.vmem [shape: bf16[64,32], index: 3, kind: input, shape index: {}]   ;;  %s1719_s4 = inlined_call_operand.vmem [shape: f32[1,32], index: 4, kind: input, shape index: {}]   ;;  %s1720_s5 = inlined_call_operand.hbm [shape: f32[16,32], index: 5, kind: output, shape index: {}]  }
   0x1   :  { %v22_v0 = vld [vmem:[%s1715_s0] sm:$0xff]  ;;  %v23_v1 = vld [vmem:[%s1715_s0 + $0x8] sm:$0xff] }
   0x2   :  { %v25_v2 = vsel %vm24_vm0, %v22_v0, 0.0  ;;  %v28_v3 = vsel %vm24_vm0, %v23_v1, 0.0 }
   0x3   :  { %26 = vadd.xlane.f32.xlu0 %v25_v2 }
   0x4   :  { %10 = vsyncpa [#allocation3], 0  ;;  %v1384_v14 = vld [vmem:[%s1716_s1 + $0x14] ss:$8 sps:$4 sm:$0xff]   ;;  %v1386_v15 = vld [vmem:[%s1716_s1 + $0x10] ss:$8 sps:$4 sm:$0xff]   ;;  %v59_v30 = vlaneseq }
   0x5   :  { %v1387_v16 = vld [vmem:[%s1716_s1 + $0x4] ss:$8 sps:$4 sm:$0xff]   ;;  %104 = vmatprep.subr.bf16.mxu0 %v1384_v14  ;;  %v1452_v17 = vmov 0   ;;  %v1389_v18 = vld [vmem:[%s1716_s1] ss:$8 sps:$4 sm:$0xff]   ;;  %v1453_v35 = vmov 0.0  }
   0x6   :  { %124 = vmatprep.mubr.bf16.mxu0 %v1452_v17  ;;  %105 = vmatpush1.bf16.msra.mxu0 %v1386_v15  ;;  %v1518_v31 = vshrl.u32 %v59_v30, 7  ;;  %v1524_v33 = vld [vmem:[%s1717_s2] sm:$0x3]  ;;  %s1454_s30 = smov 96   ;;  %s1455_s6 = smov 112   ;;  %vm1456_vm1 = vmmov 0  }
   0x7   :  { %29 = vadd.xlane.f32.xlu0 %v28_v3  ;;  %106 = vmatprep.subr.bf16.mxu0 %v1387_v16  ;;  %s1457_s2 = smov 80   ;;  %s1458_s7 = smov 64   ;;  %vm194_vm2 = vcmask 130048   ;;  %vm684_vm3 = vcmask 1043456   ;;  %vm584_vm4 = vcmask 64512   ;;  %vm1064_vm5 = vcmask 392192  }
   0x8   :  { %v61_v32 = vsub.s32 0, %v1518_v31  ;;  %1248 = vmatprep.subr.bf16.mxu1 %v1453_v35  ;;  %1250 = vmatprep.mubr.msk.bf16.mxu1 %vm1456_vm1, %v1453_v35  ;;  %v65_v63 = vsub.s32 1, %v1518_v31  ;;  %s1459_s14 = smov 16   ;;  %s1460_s17 = smov 48   ;;  %vm1121_vm6 = vcmask 523264  }
   0x9   :  { %s1461_s18 = smov 32   ;;  %s1462_s20 = smov [#allocation2]  }
   0xa   :  { %107 = vmatpush1.bf16.msra.mxu0 %v1389_v18  ;;  %v62_v34 = vrot.slane %v1524_v33, %v61_v32  ;;  %v1562_v2 = vrot.slane %v1524_v33, %v65_v63  ;;  %s1173_s21 = sshll.u32 %s1462_s20, 4  ;;  %s1174_s21 = int_to_ptr.vmem [resolvable:$true] %s1173_s21 }
   0xb   :  { %1254 = vmatprep.subr.bf16.mxu0 %v1453_v35  ;;  %s1430_s0 = scalar_lea.vmem %s1174_s21, 256  ;;  %p1435_p1 = scmp.lt.s32.totalorder %s1174_s21, %s1174_s21 }
   0xc   :  { %p1431_p0 = scmp.ne.s32.totalorder %s1174_s21, %s1430_s0  ;;  %p1436_p2 = scmp.lt.s32.totalorder %s1430_s0, %s1430_s0 }
   0xe   :  { %p1437_p3 = por %p1436_p2, %p1435_p1 }
  0x10   :  { %p1438_p4 = pnand %p1437_p3, %p1431_p0 }
  0x8c   :  { %v27_v4 = vpop.xlane.xlu0 %26 }
  0x8d   :  { %v32_v5 = vmul.f32 0.03125, %v27_v4 }
  0x8f   :  { %v34_v6 = vsub.f32 %v22_v0, %v32_v5 }
  0x90   :  { %v30_v7 = vpop.xlane.xlu0 %29 }
  0x91   :  { %v33_v8 = vmul.f32 0.03125, %v30_v7  ;;  %v36_v9 = vmul.f32 %v34_v6, %v34_v6 }
  0x93   :  { %v35_v10 = vsub.f32 %v23_v1, %v33_v8  ;;  %v38_v11 = vsel %vm24_vm0, %v36_v9, 0.0 }
  0x94   :  { %39 = vadd.xlane.f32.xlu1 %v38_v11 }
  0x95   :  { %v37_v12 = vmul.f32 %v35_v10, %v35_v10 }
  0x97   :  { %v41_v13 = vsel %vm24_vm0, %v37_v12, 0.0 }
  0x98   :  { %42 = vadd.xlane.f32.xlu1 %v41_v13 }
 0x11d   :  { %v40_v19 = vpop.xlane.xlu1 %39 }
 0x11e   :  { %v44_v20 = vmul.f32 0.03125, %v40_v19 }
 0x120   :  { %v46_v21 = vadd.f32 1e-05, %v44_v20 }
 0x121   :  { %v43_v22 = vpop.xlane.xlu1 %42 }
 0x122   :  { %v45_v23 = vmul.f32 0.03125, %v43_v22  ;;  %1394 = vrsqrt.f32 %v46_v21 }
 0x124   :  { %v47_v24 = vadd.f32 1e-05, %v45_v23 }
 0x126   :  { %1396 = vrsqrt.f32 %v47_v24 }
 0x12f   :  { %v1395_v25 = vpop.eup %1394 }
 0x130   :  { %v50_v27 = vmul.f32 %v1395_v25, %v34_v6 }
 0x133   :  { %v1397_v26 = vpop.eup %1396 }
 0x134   :  { %v51_v28 = vmul.f32 %v1397_v26, %v35_v10 }
 0x136   :  { %v52_v29 = vpack.c.bf16 %v51_v28, %v50_v27 }
 0x138   :  { %1188 = vmatmul.mubr.msk.bf16.vlgmr.msra.gmra.mxu0 %vm24_vm0, %v52_v29 }
 0x139   :  { %1256 = vmatprep.mubr.msk.bf16.mxu0 %vm1456_vm1, %v1453_v35 }
 0x1f8   :  { %v126_v36 = vpop.f32.mrf.mxu0 }
 0x1f9   :  { %v127_v37 = vadd.f32 %v126_v36, %v62_v34 }
 0x1fa   :  { %v1529_v38 = vpop.f32.mrf.mxu0 }
 0x1fb   :  { %139 = vrot.lane.b32.xlu1 %v127_v37, %s1454_s30  ;;  %136 = vrot.lane.b32.xlu0 %v127_v37, %s1455_s6  ;;  %v155_v41 = vpack.c.bf16 %v127_v37, %v127_v37  ;;  %v1566_v5 = vadd.f32 %v1529_v38, %v1562_v2 }
 0x1fc   :  { %v130_v39 = vpop.f32.mrf.mxu0 }
 0x1fd   :  { %v131_v40 = vadd.f32 %v130_v39, %v62_v34  ;;  %v183_v8 = vpack.c.bf16 %v1566_v5, %v1566_v5 }
 0x1fe   :  { %v1594_v17 = vpop.f32.mrf.mxu0 }
 0x1ff   :  { %142 = vrot.lane.b32.xlu1 %v127_v37, %s1457_s2  ;;  %149 = vrot.lane.b32.xlu0 %v131_v40, %s1454_s30  ;;  %v159_v49 = vpack.c.bf16 %v131_v40, %v131_v40  ;;  %v686_v11 = vsel %vm684_vm3, %v183_v8, 0 }
 0x203   :  { %146 = vrot.lane.b32.xlu1 %v131_v40, %s1455_s6  ;;  %192 = vrot.lane.b32.xlu0 %v155_v41, %s1458_s7 }
 0x207   :  { %152 = vrot.lane.b32.xlu1 %v131_v40, %s1457_s2 }
 0x26d   :  { %v140_v42 = vpop.permute.xlu1 %139  ;;  %v137_v43 = vpop.permute.xlu0 %136 }
 0x26e   :  { %v157_v44 = vpack.c.bf16 %v140_v42, %v140_v42  ;;  %v156_v45 = vpack.c.bf16 %v137_v43, %v137_v43 }
 0x270   :  { %242 = vrot.lane.b32.xlu1 %v156_v45, %s1458_s7  ;;  %291 = vrot.lane.b32.xlu0 %v157_v44, %s1458_s7 }
 0x271   :  { %v143_v46 = vpop.permute.xlu1 %142  ;;  %v150_v47 = vpop.permute.xlu0 %149 }
 0x272   :  { %v158_v48 = vpack.c.bf16 %v143_v46, %v143_v46  ;;  %v161_v52 = vpack.c.bf16 %v150_v47, %v150_v47 }
 0x274   :  { %340 = vrot.lane.b32.xlu1 %v158_v48, %s1458_s7  ;;  %389 = vrot.lane.b32.xlu0 %v159_v49, %s1458_s7 }
 0x275   :  { %v147_v50 = vpop.permute.xlu1 %146  ;;  %v193_v51 = vpop.permute.xlu0 %192 }
 0x276   :  { %v160_v53 = vpack.c.bf16 %v147_v50, %v147_v50  ;;  %v199_v54 = vsel %vm194_vm2, %v193_v51, 0 }
 0x277   :  { %1249 = vmatpush3.bf16.xpose.msra.mxu1 %v199_v54 }
 0x278   :  { %438 = vrot.lane.b32.xlu1 %v160_v53, %s1458_s7  ;;  %487 = vrot.lane.b32.xlu0 %v161_v52, %s1458_s7 }
 0x279   :  { %v153_v55 = vpop.permute.xlu1 %152  ;;  %1260 = vmatprep.subr.bf16.mxu1 %v1453_v35 }
 0x27a   :  { %v162_v56 = vpack.c.bf16 %v153_v55, %v153_v55 }
 0x27c   :  { %536 = vrot.lane.b32.xlu1 %v162_v56, %s1458_s7 }
 0x27e   :  { %1251 = vmatmul.mubr.msk.bf16.vlgmr.msra.gmra.mxu1 %vm194_vm2, %v155_v41 }
 0x27f   :  { %1262 = vmatprep.mubr.msk.bf16.mxu1 %vm1456_vm1, %v1453_v35 }
 0x2e2   :  { %v243_v57 = vpop.permute.xlu1 %242  ;;  %v292_v58 = vpop.permute.xlu0 %291 }
 0x2e3   :  { %v248_v59 = vsel %vm194_vm2, %v243_v57, 0  ;;  %v297_v60 = vsel %vm194_vm2, %v292_v58, 0 }
 0x2e4   :  { %1255 = vmatpush3.bf16.xpose.msra.mxu0 %v248_v59  ;;  %1261 = vmatpush3.bf16.xpose.msra.mxu1 %v297_v60 }
 0x2e5   :  { %1266 = vmatprep.subr.bf16.mxu0 %v1453_v35  ;;  %1272 = vmatprep.subr.bf16.mxu1 %v1453_v35 }
 0x2e6   :  { %v341_v61 = vpop.permute.xlu1 %340  ;;  %v390_v62 = vpop.permute.xlu0 %389 }
 0x2e7   :  { %v346_v0 = vsel %vm194_vm2, %v341_v61, 0  ;;  %v395_v1 = vsel %vm194_vm2, %v390_v62, 0 }
 0x2ea   :  { %v439_v3 = vpop.permute.xlu1 %438  ;;  %v488_v4 = vpop.permute.xlu0 %487 }
 0x2eb   :  { %1257 = vmatmul.mubr.msk.bf16.vlgmr.msra.gmra.mxu0 %vm194_vm2, %v156_v45  ;;  %1263 = vmatmul.mubr.msk.bf16.vlgmr.msra.gmra.mxu1 %vm194_vm2, %v157_v44  ;;  %v444_v6 = vsel %vm194_vm2, %v439_v3, 0  ;;  %v493_v7 = vsel %vm194_vm2, %v488_v4, 0 }
 0x2ec   :  { %1267 = vmatpush3.bf16.xpose.msra.mxu0 %v346_v0  ;;  %1273 = vmatpush3.bf16.xpose.msra.mxu1 %v395_v1 }
 0x2ed   :  { %1268 = vmatprep.mubr.msk.bf16.mxu0 %vm1456_vm1, %v1453_v35  ;;  %1274 = vmatprep.mubr.msk.bf16.mxu1 %vm1456_vm1, %v1453_v35 }
 0x2ee   :  { %1278 = vmatprep.subr.bf16.mxu0 %v1453_v35  ;;  %1284 = vmatprep.subr.bf16.mxu1 %v1453_v35  ;;  %v537_v9 = vpop.permute.xlu1 %536 }
 0x2ef   :  { %v542_v10 = vsel %vm194_vm2, %v537_v9, 0 }
 0x2f3   :  { %1269 = vmatmul.mubr.msk.bf16.vlgmr.msra.gmra.mxu0 %vm194_vm2, %v158_v48  ;;  %1275 = vmatmul.mubr.msk.bf16.vlgmr.msra.gmra.mxu1 %vm194_vm2, %v159_v49 }
 0x2f4   :  { %1279 = vmatpush3.bf16.xpose.msra.mxu0 %v444_v6  ;;  %1285 = vmatpush3.bf16.xpose.msra.mxu1 %v493_v7 }
 0x2f5   :  { %1280 = vmatprep.mubr.msk.bf16.mxu0 %vm1456_vm1, %v1453_v35  ;;  %1286 = vmatprep.mubr.msk.bf16.mxu1 %vm1456_vm1, %v1453_v35 }
 0x2f6   :  { %1290 = vmatprep.subr.bf16.mxu0 %v1453_v35  ;;  %1296 = vmatprep.subr.bf16.mxu1 %v1453_v35 }
 0x2fb   :  { %1281 = vmatmul.mubr.msk.bf16.vlgmr.msra.gmra.mxu0 %vm194_vm2, %v160_v53  ;;  %1287 = vmatmul.mubr.msk.bf16.vlgmr.msra.gmra.mxu1 %vm194_vm2, %v161_v52 }
 0x2fc   :  { %1291 = vmatpush3.bf16.xpose.msra.mxu0 %v542_v10  ;;  %1297 = vmatpush3.bf16.msra.mxu1 %v686_v11 }
 0x2fd   :  { %1292 = vmatprep.mubr.msk.bf16.mxu0 %vm1456_vm1, %v1453_v35  ;;  %1302 = vmatprep.subr.bf16.mxu0 %v1453_v35 }
 0x2fe   :  { %1298 = vmatprep.mubr.msk.bf16.mxu1 %vm1456_vm1, %v1453_v35  ;;  %1308 = vmatprep.subr.bf16.mxu1 %v1453_v35 }
 0x303   :  { %1293 = vmatmul.mubr.msk.bf16.vlgmr.msra.gmra.mxu0 %vm194_vm2, %v162_v56 }
 0x304   :  { %1304 = vmatprep.mubr.msk.bf16.mxu0 %vm1456_vm1, %v1453_v35 }
 0x33e   :  { %v235_v12 = vpop.f32.mrf.mxu1 }
 0x33f   :  { %v585_v13 = vsel %vm584_vm4, %v235_v12, -inf }
 0x340   :  { %586 = vmax.xlane.f32.xlu0 %v585_v13  ;;  %v1252_v14 = vpop.f32.mrf.mxu1 }
 0x342   :  { %v238_v15 = vpop.f32.mrf.mxu1 }
 0x344   :  { %v1253_v16 = vpop.f32.mrf.mxu1 }
 0x3ab   :  { %v284_v18 = vpop.f32.mrf.mxu0  ;;  %v333_v19 = vpop.f32.mrf.mxu1 }
 0x3ac   :  { %v588_v20 = vsel %vm584_vm4, %v284_v18, -inf  ;;  %v591_v21 = vsel %vm584_vm4, %v333_v19, -inf }
 0x3ad   :  { %589 = vmax.xlane.f32.xlu1 %v588_v20  ;;  %v1258_v22 = vpop.f32.mrf.mxu0  ;;  %592 = vmax.xlane.f32.xlu0 %v591_v21  ;;  %v1264_v23 = vpop.f32.mrf.mxu1 }
 0x3af   :  { %v287_v24 = vpop.f32.mrf.mxu0  ;;  %v336_v25 = vpop.f32.mrf.mxu1 }
 0x3b1   :  { %v1259_v26 = vpop.f32.mrf.mxu0  ;;  %v1265_v27 = vpop.f32.mrf.mxu1 }
 0x3b3   :  { %v382_v28 = vpop.f32.mrf.mxu0  ;;  %v431_v29 = vpop.f32.mrf.mxu1 }
 0x3b4   :  { %v594_v30 = vsel %vm584_vm4, %v382_v28, -inf  ;;  %v597_v36 = vsel %vm584_vm4, %v431_v29, -inf }
 0x3b5   :  { %v1270_v31 = vpop.f32.mrf.mxu0  ;;  %595 = vmax.xlane.f32.xlu0 %v594_v30  ;;  %v1276_v32 = vpop.f32.mrf.mxu1 }
 0x3b7   :  { %v385_v33 = vpop.f32.mrf.mxu0  ;;  %v434_v34 = vpop.f32.mrf.mxu1 }
 0x3b9   :  { %v1271_v37 = vpop.f32.mrf.mxu0  ;;  %598 = vmax.xlane.f32.xlu0 %v597_v36  ;;  %v1277_v38 = vpop.f32.mrf.mxu1 }
 0x3ba   :  { %v1637_v38 = vadd.f32 %v1594_v17, %v1562_v2 }
 0x3bb   :  { %v480_v39 = vpop.f32.mrf.mxu0  ;;  %v529_v40 = vpop.f32.mrf.mxu1 }
 0x3bc   :  { %v600_v41 = vsel %vm584_vm4, %v480_v39, -inf  ;;  %v603_v42 = vsel %vm584_vm4, %v529_v40, -inf }
 0x3bd   :  { %601 = vmax.xlane.f32.xlu1 %v600_v41  ;;  %v1282_v43 = vpop.f32.mrf.mxu0  ;;  %604 = vmax.xlane.f32.xlu0 %v603_v42  ;;  %v1288_v44 = vpop.f32.mrf.mxu1 }
 0x3bf   :  { %v483_v45 = vpop.f32.mrf.mxu0  ;;  %v532_v46 = vpop.f32.mrf.mxu1 }
 0x3c1   :  { %v1283_v47 = vpop.f32.mrf.mxu0  ;;  %v1289_v48 = vpop.f32.mrf.mxu1 }
 0x3c3   :  { %v578_v49 = vpop.f32.mrf.mxu0 }
 0x3c4   :  { %v606_v50 = vsel %vm584_vm4, %v578_v49, -inf }
 0x3c5   :  { %607 = vmax.xlane.f32.xlu1 %v606_v50  ;;  %v1294_v51 = vpop.f32.mrf.mxu0 }
 0x3c7   :  { %v581_v52 = vpop.f32.mrf.mxu0 }
 0x3c9   :  { %v1295_v53 = vpop.f32.mrf.mxu0  ;;  %v587_v54 = vpop.xlane.xlu0 %586 }
 0x3ca   :  { %v609_v55 = vsub.f32 %v235_v12, %v587_v54 }
 0x3cc   :  { %v617_v56 = vmul.f32 1.442695, %v609_v55 }
 0x3ce   :  { %1398 = vpow2.f32 %v617_v56 }
 0x3d6   :  { %164 = vrot.lane.b32.xlu1 %v1566_v5, %s1455_s6 }
 0x3db   :  { %v1605_v57 = vpop.eup %1398 }
 0x3dc   :  { %v633_v58 = vsel %vm584_vm4, %v1605_v57, 0.0 }
 0x3dd   :  { %634 = vadd.xlane.f32.xlu0 %v633_v58 }
 0x436   :  { %v590_v59 = vpop.xlane.xlu1 %589  ;;  %v593_v60 = vpop.xlane.xlu0 %592 }
 0x437   :  { %v610_v61 = vsub.f32 %v284_v18, %v590_v59  ;;  %v611_v62 = vsub.f32 %v333_v19, %v593_v60 }
 0x439   :  { %v619_v63 = vmul.f32 1.442695, %v610_v61  ;;  %v621_v0 = vmul.f32 1.442695, %v611_v62 }
 0x43b   :  { %1400 = vpow2.f32 %v619_v63 }
 0x43c   :  { %1402 = vpow2.f32 %v621_v0 }
 0x43e   :  { %v596_v1 = vpop.xlane.xlu0 %595 }
 0x43f   :  { %v612_v3 = vsub.f32 %v382_v28, %v596_v1 }
 0x441   :  { %v623_v4 = vmul.f32 1.442695, %v612_v3  ;;  %v187_v3 = vpack.c.bf16 %v1637_v38, %v1637_v38 }
 0x442   :  { %v599_v6 = vpop.xlane.xlu0 %598 }
 0x443   :  { %1404 = vpow2.f32 %v623_v4  ;;  %v613_v7 = vsub.f32 %v431_v29, %v599_v6 }
 0x445   :  { %v625_v8 = vmul.f32 1.442695, %v613_v7 }
 0x446   :  { %v602_v9 = vpop.xlane.xlu1 %601  ;;  %v605_v10 = vpop.xlane.xlu0 %604 }
 0x447   :  { %1406 = vpow2.f32 %v625_v8  ;;  %v614_v11 = vsub.f32 %v480_v39, %v602_v9  ;;  %v615_v12 = vsub.f32 %v529_v40, %v605_v10 }
 0x448   :  { %v1401_v13 = vpop.eup %1400 }
 0x449   :  { %v1609_v14 = vpop.eup %1402  ;;  %v627_v15 = vmul.f32 1.442695, %v614_v11  ;;  %v629_v16 = vmul.f32 1.442695, %v615_v12  ;;  %v636_v18 = vsel %vm584_vm4, %v1401_v13, 0.0  ;;  %v870_v11 = vsel %vm684_vm3, %v187_v3, 0 }
 0x44a   :  { %637 = vadd.xlane.f32.xlu1 %v636_v18  ;;  %v639_v19 = vsel %vm584_vm4, %v1609_v14, 0.0 }
 0x44b   :  { %1408 = vpow2.f32 %v627_v15  ;;  %640 = vadd.xlane.f32.xlu0 %v639_v19 }
 0x44c   :  { %1410 = vpow2.f32 %v629_v16 }
 0x44e   :  { %v608_v20 = vpop.xlane.xlu1 %607 }
 0x44f   :  { %v616_v21 = vsub.f32 %v578_v49, %v608_v20 }
 0x450   :  { %v1405_v22 = vpop.eup %1404 }
 0x451   :  { %v631_v23 = vmul.f32 1.442695, %v616_v21  ;;  %v642_v24 = vsel %vm584_vm4, %v1405_v22, 0.0 }
 0x452   :  { %v165_v25 = vpop.permute.xlu1 %164  ;;  %643 = vadd.xlane.f32.xlu1 %v642_v24 }
 0x453   :  { %1412 = vpow2.f32 %v631_v23  ;;  %v184_v26 = vpack.c.bf16 %v165_v25, %v165_v25 }
 0x454   :  { %v1615_v27 = vpop.eup %1406 }
 0x455   :  { %v732_v28 = vsel %vm684_vm3, %v184_v26, 0  ;;  %v645_v29 = vsel %vm584_vm4, %v1615_v27, 0.0 }
 0x456   :  { %1303 = vmatpush3.bf16.msra.mxu0 %v732_v28  ;;  %646 = vadd.xlane.f32.xlu0 %v645_v29 }
 0x457   :  { %1314 = vmatprep.subr.bf16.mxu0 %v1453_v35 }
 0x458   :  { %v1621_v30 = vpop.eup %1408 }
 0x459   :  { %v1623_v31 = vpop.eup %1410  ;;  %v648_v32 = vsel %vm584_vm4, %v1621_v30, 0.0 }
 0x45a   :  { %649 = vadd.xlane.f32.xlu1 %v648_v32  ;;  %v651_v33 = vsel %vm584_vm4, %v1623_v31, 0.0 }
 0x45b   :  { %652 = vadd.xlane.f32.xlu0 %v651_v33 }
 0x460   :  { %v1629_v34 = vpop.eup %1412 }
 0x461   :  { %v654_v36 = vsel %vm584_vm4, %v1629_v34, 0.0 }
 0x462   :  { %655 = vadd.xlane.f32.xlu0 %v654_v36 }
 0x466   :  { %v635_v37 = vpop.xlane.xlu0 %634 }
 0x467   :  { %1414 = vrcp.f32 %v635_v37  ;;  %v1391_v37 = vld [vmem:[%s1718_s3 + $0x10] sm:$0xff]  }
 0x46b   :  { %170 = vrot.lane.b32.xlu1 %v1566_v5, %s1457_s2 }
 0x46f   :  { %174 = vrot.lane.b32.xlu1 %v1637_v38, %s1455_s6 }
 0x473   :  { %177 = vrot.lane.b32.xlu1 %v1637_v38, %s1454_s30 }
 0x474   :  { %v1415_v39 = vpop.eup %1414 }
 0x475   :  { %v665_v40 = vmul.f32 %v1415_v39, %v1605_v57 }
 0x477   :  { %180 = vrot.lane.b32.xlu1 %v1637_v38, %s1457_s2  ;;  %v673_v41 = vpack.c.bf16 %v665_v40, %v665_v40  ;;  %v1392_v40 = vld [vmem:[%s1718_s3 + $0x8] sm:$0xff]  }
 0x478   :  { %167 = vrot.lane.b32.xlu0 %v1566_v5, %s1454_s30 }
 0x479   :  { %1299 = vmatmul.mubr.msk.bf16.vlgmr.msra.gmra.mxu1 %vm584_vm4, %v673_v41 }
 0x47a   :  { %1310 = vmatprep.mubr.msk.bf16.mxu1 %vm1456_vm1, %v1453_v35 }
 0x4d3   :  { %v638_v2 = vpop.xlane.xlu1 %637 }
 0x4d4   :  { %1416 = vrcp.f32 %v638_v2  ;;  %v641_v42 = vpop.xlane.xlu0 %640 }
 0x4db   :  { %v644_v17 = vpop.xlane.xlu1 %643 }
 0x4dc   :  { %1418 = vrcp.f32 %v644_v17 }
 0x4dd   :  { %1420 = vrcp.f32 %v641_v42 }
 0x4df   :  { %v647_v44 = vpop.xlane.xlu0 %646 }
 0x4e1   :  { %v1417_v43 = vpop.eup %1416 }
 0x4e2   :  { %v666_v45 = vmul.f32 %v1417_v43, %v1401_v13 }
 0x4e3   :  { %v650_v46 = vpop.xlane.xlu1 %649 }
 0x4e4   :  { %1422 = vrcp.f32 %v650_v46  ;;  %v674_v47 = vpack.c.bf16 %v666_v45, %v666_v45  ;;  %v653_v5 = vpop.xlane.xlu0 %652 }
 0x4e5   :  { %1424 = vrcp.f32 %v647_v44 }
 0x4e6   :  { %1305 = vmatmul.mubr.msk.bf16.vlgmr.msra.gmra.mxu0 %vm584_vm4, %v674_v47 }
 0x4e7   :  { %v171_v48 = vpop.permute.xlu1 %170  ;;  %1316 = vmatprep.mubr.msk.bf16.mxu0 %vm1456_vm1, %v1453_v35 }
 0x4e8   :  { %v186_v49 = vpack.c.bf16 %v171_v48, %v171_v48 }
 0x4e9   :  { %v1419_v50 = vpop.eup %1418 }
 0x4ea   :  { %v824_v51 = vsel %vm684_vm3, %v186_v49, 0  ;;  %v668_v52 = vmul.f32 %v1419_v50, %v1405_v22  ;;  %v1421_v57 = vpop.eup %1420 }
 0x4eb   :  { %1315 = vmatpush3.bf16.msra.mxu0 %v824_v51  ;;  %v175_v53 = vpop.permute.xlu1 %174  ;;  %v656_v54 = vpop.xlane.xlu0 %655  ;;  %v667_v62 = vmul.f32 %v1421_v57, %v1609_v14 }
 0x4ec   :  { %v188_v55 = vpack.c.bf16 %v175_v53, %v175_v53  ;;  %1426 = vrcp.f32 %v656_v54  ;;  %v676_v56 = vpack.c.bf16 %v668_v52, %v668_v52  ;;  %1326 = vmatprep.subr.bf16.mxu0 %v1453_v35 }
 0x4ed   :  { %1428 = vrcp.f32 %v653_v5  ;;  %v675_v7 = vpack.c.bf16 %v667_v62, %v667_v62  ;;  %v1393_v5 = vld [vmem:[%s1718_s3] sm:$0xff]  }
 0x4ee   :  { %v916_v58 = vsel %vm684_vm3, %v188_v55, 0  ;;  %1317 = vmatmul.mubr.msk.bf16.vlgmr.msra.gmra.mxu0 %vm584_vm4, %v676_v56 }
 0x4ef   :  { %1327 = vmatpush3.bf16.msra.mxu0 %v916_v58  ;;  %v178_v59 = vpop.permute.xlu1 %177  ;;  %v168_v60 = vpop.permute.xlu0 %167  ;;  %1328 = vmatprep.mubr.msk.bf16.mxu0 %vm1456_vm1, %v1453_v35 }
 0x4f0   :  { %v185_v61 = vpack.c.bf16 %v168_v60, %v168_v60  ;;  %1338 = vmatprep.subr.bf16.mxu0 %v1453_v35  ;;  %v189_v14 = vpack.c.bf16 %v178_v59, %v178_v59 }
 0x4f1   :  { %v1423_v63 = vpop.eup %1422 }
 0x4f2   :  { %v778_v0 = vsel %vm684_vm3, %v185_v61, 0  ;;  %v670_v1 = vmul.f32 %v1423_v63, %v1621_v30  ;;  %v1425_v9 = vpop.eup %1424  ;;  %v962_v20 = vsel %vm684_vm3, %v189_v14, 0 }
 0x4f3   :  { %v181_v4 = vpop.permute.xlu1 %180  ;;  %1309 = vmatpush3.bf16.msra.mxu1 %v778_v0  ;;  %v669_v12 = vmul.f32 %v1425_v9, %v1615_v27 }
 0x4f4   :  { %v190_v6 = vpack.c.bf16 %v181_v4, %v181_v4  ;;  %1320 = vmatprep.subr.bf16.mxu1 %v1453_v35  ;;  %v678_v8 = vpack.c.bf16 %v670_v1, %v670_v1 }
 0x4f5   :  { %v677_v16 = vpack.c.bf16 %v669_v12, %v669_v12 }
 0x4f6   :  { %v1008_v10 = vsel %vm684_vm3, %v190_v6, 0  ;;  %1311 = vmatmul.mubr.msk.bf16.vlgmr.msra.gmra.mxu1 %vm584_vm4, %v675_v7  ;;  %1329 = vmatmul.mubr.msk.bf16.vlgmr.msra.gmra.mxu0 %vm584_vm4, %v678_v8 }
 0x4f7   :  { %1321 = vmatpush3.bf16.msra.mxu1 %v870_v11  ;;  %1339 = vmatpush3.bf16.msra.mxu0 %v1008_v10 }
 0x4f8   :  { %1322 = vmatprep.mubr.msk.bf16.mxu1 %vm1456_vm1, %v1453_v35  ;;  %1332 = vmatprep.subr.bf16.mxu1 %v1453_v35 }
 0x4f9   :  { %v1427_v13 = vpop.eup %1426  ;;  %1340 = vmatprep.mubr.msk.bf16.mxu0 %vm1456_vm1, %v1453_v35 }
 0x4fa   :  { %v672_v15 = vmul.f32 %v1427_v13, %v1629_v34  ;;  %v1429_v19 = vpop.eup %1428  ;;  %v1205_v13 = vld [vmem:[%s1719_s4] ss:$0 sm:$0xff] }
 0x4fb   :  { %v671_v21 = vmul.f32 %v1429_v19, %v1623_v31  ;;  %v1390_v31 = vld [vmem:[%s1718_s3 + $0x18] sm:$0xff]  }
 0x4fc   :  { %v680_v18 = vpack.c.bf16 %v672_v15, %v672_v15 }
 0x4fd   :  { %v679_v22 = vpack.c.bf16 %v671_v21, %v671_v21 }
 0x4fe   :  { %1323 = vmatmul.mubr.msk.bf16.vlgmr.msra.gmra.mxu1 %vm584_vm4, %v677_v16  ;;  %1341 = vmatmul.mubr.msk.bf16.vlgmr.msra.gmra.mxu0 %vm584_vm4, %v680_v18 }
 0x4ff   :  { %1333 = vmatpush3.bf16.msra.mxu1 %v962_v20  ;;  %1334 = vmatprep.mubr.msk.bf16.mxu1 %vm1456_vm1, %v1453_v35 }
 0x500   :  { %1344 = vmatprep.subr.bf16.mxu1 %v1453_v35 }
 0x506   :  { %1335 = vmatmul.mubr.msk.bf16.vlgmr.msra.gmra.mxu1 %vm584_vm4, %v679_v22 }
 0x507   :  { %1352 = vmatprep.mubr.msk.bf16.mxu1 %vm1456_vm1, %v1453_v35  ;;  %1345 = vmatpush3.bf16.msra.mxu1 %v1390_v31 }
 0x508   :  { %1346 = vmatprep.subr.bf16.mxu1 %v1453_v35 }
 0x50b   :  { %1347 = vmatpush3.bf16.msra.mxu1 %v1391_v37 }
 0x50c   :  { %1348 = vmatprep.subr.bf16.mxu1 %v1453_v35 }
 0x50f   :  { %1349 = vmatpush3.bf16.msra.mxu1 %v1392_v40 }
 0x510   :  { %1350 = vmatprep.subr.bf16.mxu1 %v1453_v35 }
 0x513   :  { %1351 = vmatpush3.bf16.msra.mxu1 %v1393_v5 }
 0x539   :  { %v722_v23 = vpop.f32.mrf.mxu1 }
 0x53b   :  { %v1300_v24 = vpop.f32.mrf.mxu1 }
 0x53d   :  { %v725_v25 = vpop.f32.mrf.mxu1 }
 0x53f   :  { %v1301_v26 = vpop.f32.mrf.mxu1 }
 0x5a6   :  { %v768_v27 = vpop.f32.mrf.mxu0 }
 0x5a8   :  { %v1306_v28 = vpop.f32.mrf.mxu0 }
 0x5aa   :  { %v771_v29 = vpop.f32.mrf.mxu0 }
 0x5ac   :  { %v1307_v30 = vpop.f32.mrf.mxu0 }
 0x5ae   :  { %v860_v32 = vpop.f32.mrf.mxu0 }
 0x5b0   :  { %v1318_v33 = vpop.f32.mrf.mxu0 }
 0x5b2   :  { %v863_v34 = vpop.f32.mrf.mxu0 }
 0x5b4   :  { %v1319_v36 = vpop.f32.mrf.mxu0 }
 0x5b6   :  { %v814_v38 = vpop.f32.mrf.mxu1  ;;  %v952_v39 = vpop.f32.mrf.mxu0 }
 0x5b7   :  { %v1369_v41 = vpack.i.bf16 %v952_v39, %v768_v27 }
 0x5b8   :  { %v1312_v2 = vpop.f32.mrf.mxu1  ;;  %v1330_v17 = vpop.f32.mrf.mxu0 }
 0x5b9   :  { %1370 = vrot.lane.b32.xlu0 %v1369_v41, %s1459_s14 }
 0x5ba   :  { %v817_v42 = vpop.f32.mrf.mxu1  ;;  %v955_v43 = vpop.f32.mrf.mxu0 }
 0x5bc   :  { %v1313_v44 = vpop.f32.mrf.mxu1  ;;  %v1331_v45 = vpop.f32.mrf.mxu0 }
 0x5be   :  { %v906_v46 = vpop.f32.mrf.mxu1  ;;  %v1044_v47 = vpop.f32.mrf.mxu0 }
 0x5bf   :  { %v1379_v48 = vpack.i.bf16 %v1044_v47, %v860_v32 }
 0x5c0   :  { %v1324_v49 = vpop.f32.mrf.mxu1  ;;  %v1342_v50 = vpop.f32.mrf.mxu0 }
 0x5c1   :  { %1380 = vrot.lane.b32.xlu0 %v1379_v48, %s1460_s17 }
 0x5c2   :  { %v909_v51 = vpop.f32.mrf.mxu1  ;;  %v1047_v52 = vpop.f32.mrf.mxu0 }
 0x5c4   :  { %v1325_v53 = vpop.f32.mrf.mxu1  ;;  %v1343_v54 = vpop.f32.mrf.mxu0 }
 0x5c6   :  { %v998_v55 = vpop.f32.mrf.mxu1 }
 0x5c7   :  { %v1374_v35 = vpack.i.bf16 %v998_v55, %v814_v38 }
 0x5c8   :  { %v1336_v56 = vpop.f32.mrf.mxu1 }
 0x5c9   :  { %1375 = vrot.lane.b32.xlu1 %v1374_v35, %s1461_s18 }
 0x5ca   :  { %v1001_v57 = vpop.f32.mrf.mxu1 }
 0x5cc   :  { %v1337_v58 = vpop.f32.mrf.mxu1 }
 0x62b   :  { %v1371_v59 = vpop.permute.xlu0 %1370 }
 0x62c   :  { %v1373_v60 = vunpack.i.h.bf16 %v1371_v59  ;;  %v1372_v61 = vunpack.i.l.bf16 %v1371_v59 }
 0x62e   :  { %v1078_v3 = vsel %vm194_vm2, %v906_v46, %v1373_v60  ;;  %v1062_v4 = vsel %vm194_vm2, %v722_v23, %v1372_v61 }
 0x633   :  { %v1381_v62 = vpop.permute.xlu0 %1380 }
 0x634   :  { %v1383_v6 = vunpack.i.h.bf16 %v1381_v62  ;;  %v1382_v7 = vunpack.i.l.bf16 %v1381_v62 }
 0x63b   :  { %v1376_v63 = vpop.permute.xlu1 %1375 }
 0x63c   :  { %v1378_v0 = vunpack.i.h.bf16 %v1376_v63  ;;  %v1377_v1 = vunpack.i.l.bf16 %v1376_v63 }
 0x63e   :  { %v1063_v8 = vsel %vm24_vm0, %v1062_v4, %v1377_v1  ;;  %v1079_v9 = vsel %vm24_vm0, %v1078_v3, %v1378_v0 }
 0x63f   :  { %v1065_v10 = vsel %vm1064_vm5, %v1063_v8, %v1382_v7  ;;  %v1080_v11 = vsel %vm1064_vm5, %v1079_v9, %v1383_v6 }
 0x640   :  { %v1081_v12 = vpack.c.bf16 %v1080_v11, %v1065_v10 }
 0x642   :  { %1353 = vmatmul.mubr.msk.bf16.vlgmr.msra.gmra.mxu1 %vm1121_vm6, %v1081_v12 }
 0x702   :  { %v1159_v14 = vpop.f32.mrf.mxu1 }
 0x703   :  { %v1160_v15 = vadd.f32 %v1205_v13, %v1159_v14 }
 0x704   :  { %v1354_v16 = vpop.f32.mrf.mxu1 }
 0x705   :  { %1166 = vst.msk [vmem:[#allocation2] sm:$0xff] %vm24_vm0, %v1160_v15 }
 0x706   :  { %v1162_v18 = vpop.f32.mrf.mxu1 }
 0x707   :  { %v1163_v19 = vadd.f32 %v1205_v13, %v1162_v18 }
 0x708   :  { %v1355_v20 = vpop.f32.mrf.mxu1 }
 0x709   :  { %1167 = vst.msk [vmem:[#allocation2 + $0x8] sm:$0xff] %vm24_vm0, %v1163_v19 }
 0x70a   :  { %1441 = shalt.err (!%p1438_p4)
}
 0x70b   :  { %s1463_s4 = smov 128   ;;  %s1464_s22 = smov 8  }
 0x70c   :  { %1179 = dma.vmem_to_hbm [thread:$0]  %s1174_s21, 256, %s1720_s5, [#allocation3], %s1463_s4, %s1463_s4, %s1464_s22  }
 0x70d   :  { %1450 = dma.done.wait [#allocation3], 256  }
 0x70e   :  { %1451 = vsyncadd [#allocation3], 4294967040 }
 0x70f   :  { %1183 = vsyncpa [#allocation3], 1 }

</bundles_post_ra>
